<compile_context>
chip_gen: v6e
topology: v6e:2x2x1
jax: 0.10.0
libtpu: 0.0.40
codegen_flags: <defaults>
</compile_context>

<pallas_src>
import functools

import jax
import jax.numpy as jnp
from jax import lax
from jax.experimental import pallas as pl
from jax.experimental.pallas import tpu as pltpu

_MIB = 1024 * 1024


# ---------------------------------------------------------------------------
# helpers
# ---------------------------------------------------------------------------

def _round_up(x, m):
    return ((x + m - 1) // m) * m


@functools.lru_cache(maxsize=None)
def _vmem_budget_bytes():
    """Per-generation VMEM budget (capacity minus headroom for Mosaic)."""
    try:
        cap = int(pltpu.get_tpu_info().vmem_capacity_bytes)
    except Exception:
        cap = None
    if not cap or cap <= 0:
        cap = 64 * _MIB  # conservative fallback (v7x per-TC capacity)
    # 128 MiB (v5e/v6e) -> ~112 MiB budget; 64 MiB (v7x per TC) -> ~48 MiB.
    return max(cap - 16 * _MIB, 32 * _MIB)


@functools.lru_cache(maxsize=None)
def _default_num_splits():
    """2 on chips exposing 2 TensorCores per device (v7x / v4 megacore)."""
    try:
        kind = jax.devices()[0].device_kind.lower()
    except Exception:
        return 1
    if ("v7" in kind) or ("7x" in kind) or ("v4" in kind):
        return 2
    return 1


def _pick_block_k(n, k_elems, itemsize, *, n_resident_grams, budget):
    """Largest 128-multiple K tile whose working set fits the VMEM budget.

    Working set = double-buffered (n, tk) feature tiles + n_resident_grams
    (n, n) f32 gram buffers (accumulator and/or pipelined target/output).
    """
    k128 = _round_up(k_elems, 128)
    resident = n_resident_grams * n * n * 4
    headroom = 2 * _MIB
    avail = budget - resident - headroom
    max_tk = avail // max(2 * n * itemsize, 1)
    tk = min(int(max_tk), k128)
    tk = (tk // 128) * 128
    # TODO(synk): for n so large that even tk=128 + the (n,n) grams overflow
    # VMEM (n >~ 1500 f32 on v7x), tile the gram output into row blocks.
    return max(tk, 128)


def _normalize_tk(tk, k_elems):
    tk = _round_up(int(tk), 128)
    return max(128, min(tk, _round_up(k_elems, 128)))


def _prep_feats(x, stream_dtype=None):
    """NCHW -> (N*C, H*W) view (no padding copy); optional streaming cast."""
    a, b, c, d = x.shape
    feats = x.reshape(a * b, c * d)
    if stream_dtype is not None and feats.dtype != jnp.dtype(stream_dtype):
        feats = feats.astype(stream_dtype)
    inv_denom = 1.0 / float(a * b * c * d)
    return feats, a * b, c * d, inv_denom


# ---------------------------------------------------------------------------
# kernel bodies
# ---------------------------------------------------------------------------

def _accumulate_tile(f, acc_ref, global_k, *, tk, k_elems, ragged):
    """acc += F_tile @ F_tile.T with an iota tail mask on boundary tiles."""
    dot_dims = (((1,), (1,)), ((), ()))
    if not ragged:
        acc_ref[...] += lax.dot_general(
            f, f, dot_dims, preferred_element_type=jnp.float32)
        return

    start = global_k * tk
    is_full = start + tk <= k_elems

    @pl.when(is_full)
    def _():
        acc_ref[...] += lax.dot_general(
            f, f, dot_dims, preferred_element_type=jnp.float32)

    @pl.when(jnp.logical_not(is_full))
    def _():
        col = start + lax.broadcasted_iota(jnp.int32, f.shape, 1)
        fm = jnp.where(col < k_elems, f, jnp.zeros_like(f))
        acc_ref[...] += lax.dot_general(
            fm, fm, dot_dims, preferred_element_type=jnp.float32)


def _gram_kernel(feat_ref, g_ref, *, tk, k_elems, kk, ragged, inv_denom):
    """Partial gram per K split; grid = (num_splits [parallel], kk [arbitrary])."""
    s = pl.program_id(0)
    k = pl.program_id(1)

    @pl.when(k == 0)
    def _():
        g_ref[...] = jnp.zeros_like(g_ref)

    _accumulate_tile(feat_ref[...], g_ref, s * kk + k,
                     tk=tk, k_elems=k_elems, ragged=ragged)

    @pl.when(k == pl.num_programs(1) - 1)
    def _():
        g_ref[...] = g_ref[...] * inv_denom        # multiply, not divide


def _style_loss_kernel(feat_ref, target_ref, loss_ref, acc_ref, *,
                       tk, k_elems, ragged, inv_denom, inv_nn):
    """Fused gram + MSE; only the scalar loss (SMEM) leaves the kernel."""
    k = pl.program_id(0)

    @pl.when(k == 0)
    def _():
        acc_ref[...] = jnp.zeros_like(acc_ref)

    _accumulate_tile(feat_ref[...], acc_ref, k,
                     tk=tk, k_elems=k_elems, ragged=ragged)

    @pl.when(k == pl.num_programs(0) - 1)
    def _():
        diff = acc_ref[...] * inv_denom - target_ref[...].astype(jnp.float32)
        loss_ref[0, 0] = jnp.sum(diff * diff) * inv_nn


# ---------------------------------------------------------------------------
# wrappers
# ---------------------------------------------------------------------------

def gram_matrix(x, *, block_k=None, num_splits=None, stream_dtype=None):
    """Pallas equivalent of the PyTorch gram_matrix helper."""
    feats, n, k_elems, inv_denom = _prep_feats(x, stream_dtype)
    itemsize = feats.dtype.itemsize
    budget = _vmem_budget_bytes()
    tk = _normalize_tk(
        block_k if block_k is not None else _pick_block_k(
            n, k_elems, itemsize, n_resident_grams=2, budget=budget),
        k_elems)
    num_k = pl.cdiv(k_elems, tk)
    nsplit = num_splits if num_splits is not None else _default_num_splits()
    nsplit = max(1, min(int(nsplit), num_k))
    kk = pl.cdiv(num_k, nsplit)                 # K tiles handled per split
    ragged = (nsplit * kk * tk != k_elems)      # tail mask needed?

    partials = pl.pallas_call(
        functools.partial(_gram_kernel, tk=tk, k_elems=k_elems, kk=kk,
                          ragged=ragged, inv_denom=inv_denom),
        grid=(nsplit, kk),
        in_specs=[pl.BlockSpec(
            (n, tk),
            # clamp surplus tiles of the last split to a valid block index;
            # the in-kernel mask zeroes their contribution.
            lambda s, k: (0, jnp.minimum(s * kk + k, num_k - 1)))],
        out_specs=pl.BlockSpec((None, n, n), lambda s, k: (s, 0, 0)),
        out_shape=jax.ShapeDtypeStruct((nsplit, n, n), jnp.float32),
        compiler_params=pltpu.CompilerParams(
            dimension_semantics=("parallel", "arbitrary"),
            vmem_limit_bytes=budget),
    )(feats)
    return partials[0] if nsplit == 1 else jnp.sum(partials, axis=0)


def style_loss_forward(x, target_gram, *, block_k=None, num_splits=None,
                       stream_dtype=None):
    """Forward: MSE(gram(x), target_gram). Returns (x unchanged, loss)."""
    nsplit = num_splits if num_splits is not None else _default_num_splits()
    if nsplit > 1:
        # v7x / v4 megacore: split the K reduction across both TensorCores;
        # combine the partial grams + MSE in a tiny XLA epilogue.
        g = gram_matrix(x, block_k=block_k, num_splits=nsplit,
                        stream_dtype=stream_dtype)
        diff = g - target_gram.astype(jnp.float32)
        return x, jnp.mean(diff * diff)

    # Fused single-TensorCore path: gram accumulates in a VMEM scratch and
    # only the scalar loss is written out (SMEM) — no gram writeback to HBM.
    feats, n, k_elems, inv_denom = _prep_feats(x, stream_dtype)
    itemsize = feats.dtype.itemsize
    budget = _vmem_budget_bytes()
    # n_resident_grams=3: f32 accumulator scratch + double-buffered target.
    tk = _normalize_tk(
        block_k if block_k is not None else _pick_block_k(
            n, k_elems, itemsize, n_resident_grams=3, budget=budget),
        k_elems)
    num_k = pl.cdiv(k_elems, tk)
    ragged = (num_k * tk != k_elems)
    inv_nn = 1.0 / float(n * n)

    loss = pl.pallas_call(
        functools.partial(_style_loss_kernel, tk=tk, k_elems=k_elems,
                          ragged=ragged, inv_denom=inv_denom, inv_nn=inv_nn),
        grid=(num_k,),
        in_specs=[
            pl.BlockSpec((n, tk), lambda k: (0, k)),   # streamed K tiles
            pl.BlockSpec((n, n), lambda k: (0, 0)),    # resident target gram
        ],
        out_specs=pl.BlockSpec(memory_space=pltpu.SMEM),
        out_shape=jax.ShapeDtypeStruct((1, 1), jnp.float32),
        scratch_shapes=[pltpu.VMEM((n, n), jnp.float32)],
        compiler_params=pltpu.CompilerParams(
            dimension_semantics=("arbitrary",),
            vmem_limit_bytes=budget),
    )(feats, target_gram.astype(jnp.float32))
    return x, loss[0, 0]


class StyleLoss:
    """JAX/Pallas port of the PyTorch StyleLoss module (forward only)."""

    def __init__(self, target_feature, *, block_k=None, num_splits=None,
                 stream_dtype=None):
        self._block_k = block_k
        self._num_splits = num_splits
        self._stream_dtype = stream_dtype
        # target gram is "detached" by construction; computed once in native
        # precision (the one-time cost makes bf16 streaming pointless here).
        self.target = gram_matrix(target_feature, block_k=block_k,
                                  num_splits=num_splits)
        self.loss = None

    def __call__(self, x):
        out, loss = style_loss_forward(
            x, self.target, block_k=self._block_k,
            num_splits=self._num_splits, stream_dtype=self._stream_dtype)
        self.loss = loss
        return out


# ---------------------------------------------------------------------------
# self-test
# ---------------------------------------------------------------------------

if __name__ == "__main__":
    key = jax.random.PRNGKey(0)
    k_tgt, k_x = jax.random.split(key)
    target_feature = jax.random.normal(k_tgt, (2, 4, 16, 16), dtype=jnp.float32)
    x = jax.random.normal(k_x, (2, 4, 16, 16), dtype=jnp.float32)

    def ref_gram(inp):
        a, b, c, d = inp.shape
        f = inp.reshape(a * b, c * d).astype(jnp.float32)
        return (f @ f.T) / (a * b * c * d)

    def ref_loss(inp, tgt):
        return jnp.mean((ref_gram(inp) - ref_gram(tgt)) ** 2)

    RTOL, ATOL = 1e-4, 1e-5

    # 1) module forward, auto tile size / auto split count
    module = StyleLoss(target_feature)
    out = module(x)
    jax.block_until_ready(out)
    jax.block_until_ready(module.loss)
    assert jnp.allclose(out, x)
    assert jnp.allclose(module.target, ref_gram(target_feature), rtol=RTOL, atol=ATOL)
    assert jnp.allclose(module.loss, ref_loss(x, target_feature), rtol=RTOL, atol=ATOL)

    # 2) multi-step K accumulation on the fused scalar-loss path
    g_tiled = gram_matrix(x, block_k=128, num_splits=1)
    assert jnp.allclose(g_tiled, ref_gram(x), rtol=RTOL, atol=ATOL)
    _, loss_tiled = style_loss_forward(x, ref_gram(target_feature),
                                       block_k=128, num_splits=1)
    assert jnp.allclose(loss_tiled, ref_loss(x, target_feature), rtol=RTOL, atol=ATOL)

    # 3) explicit 2-way K split (parallel axis -> both TCs on v7x/v4;
    #    serial but correct elsewhere)
    g_split = gram_matrix(x, block_k=128, num_splits=2)
    assert jnp.allclose(g_split, ref_gram(x), rtol=RTOL, atol=ATOL)
    _, loss_split = style_loss_forward(x, ref_gram(target_feature),
                                       block_k=128, num_splits=2)
    assert jnp.allclose(loss_split, ref_loss(x, target_feature), rtol=RTOL, atol=ATOL)

    # 4) ragged H*W (not a multiple of 128): exercises the in-kernel tail mask
    xr = jax.random.normal(jax.random.PRNGKey(1), (2, 4, 18, 18), dtype=jnp.float32)
    tr = jax.random.normal(jax.random.PRNGKey(2), (2, 4, 18, 18), dtype=jnp.float32)
    mod_r = StyleLoss(tr, block_k=128)
    _ = mod_r(xr)
    jax.block_until_ready(mod_r.loss)
    assert jnp.allclose(mod_r.target, ref_gram(tr), rtol=RTOL, atol=ATOL)
    assert jnp.allclose(mod_r.loss, ref_loss(xr, tr), rtol=RTOL, atol=ATOL)
    # ragged + 2-way split also exercises the clamped surplus-tile path
    g_rs = gram_matrix(xr, block_k=128, num_splits=2)
    assert jnp.allclose(g_rs, ref_gram(xr), rtol=RTOL, atol=ATOL)

    # 5) opt-in bf16 feature streaming (halves feature HBM traffic; looser tol)
    _, loss_bf16 = style_loss_forward(x, ref_gram(target_feature),
                                      stream_dtype=jnp.bfloat16, num_splits=1)
    assert jnp.allclose(loss_bf16, ref_loss(x, target_feature), rtol=5e-2, atol=1e-4)

    print("KERNEL_OK")
</pallas_src>

<mosaic_0001>
module attributes {stable_mosaic.version = 11 : i64} {
  func.func @_gram_kernel(%arg0: i32, %arg1: i32, %arg2: memref<8x256xf32, #tpu.memory_space<vmem>>, %arg3: memref<1x8x8xf32, #tpu.memory_space<vmem>>) attributes {dimension_semantics = [#tpu.dimension_semantics<parallel>, #tpu.dimension_semantics<arbitrary>], iteration_bounds = array<i64: 1, 1>, scalar_prefetch = 0 : i64, scratch_operands = 0 : i64, tpu.core_type = #tpu.core_type<tc>, window_params = [{transform_indices = @transform_0, window_bounds = array<i64: 8, 256>}, {transform_indices = @transform_1, window_bounds = array<i64: 1, 8, 8>}]} {
    %c0_i32 = arith.constant 0 : i32
    %0 = arith.cmpi eq, %arg1, %c0_i32 : i32
    %1 = arith.extui %0 : i1 to i32
    %c0_i32_0 = arith.constant 0 : i32
    %2 = arith.cmpi ne, %1, %c0_i32_0 : i32
    scf.if %2 {
      %cst_10 = arith.constant 0.000000e+00 : f32
      %14 = vector.broadcast %cst_10 : f32 to vector<8x8xf32>
      %c0_11 = arith.constant 0 : index
      %c0_12 = arith.constant 0 : index
      %c0_13 = arith.constant 0 : index
      %15 = vector.load %arg3[%c0_11, %c0_12, %c0_13] : memref<1x8x8xf32, #tpu.memory_space<vmem>>, vector<1x8x8xf32>
      %16 = vector.shape_cast %15 : vector<1x8x8xf32> to vector<8x8xf32>
      %17 = vector.shape_cast %14 : vector<8x8xf32> to vector<1x8x8xf32>
      tpu.vector_store %arg3[%c0_11, %c0_12, %c0_13], %17 {strides = array<i32>} : memref<1x8x8xf32, #tpu.memory_space<vmem>>, vector<1x8x8xf32>,
    } else {
    }
    %c0 = arith.constant 0 : index
    %c0_1 = arith.constant 0 : index
    %3 = vector.load %arg2[%c0, %c0_1] : memref<8x256xf32, #tpu.memory_space<vmem>>, vector<8x256xf32>
    %c0_2 = arith.constant 0 : index
    %c0_3 = arith.constant 0 : index
    %c0_4 = arith.constant 0 : index
    %4 = vector.load %arg3[%c0_2, %c0_3, %c0_4] : memref<1x8x8xf32, #tpu.memory_space<vmem>>, vector<1x8x8xf32>
    %5 = vector.shape_cast %4 : vector<1x8x8xf32> to vector<8x8xf32>
    %cst = arith.constant dense<0.000000e+00> : vector<8x8xf32>
    %6 = tpu.matmul %3, %3, %cst {dimension_numbers = #tpu.dot_dimension_numbers<[1], [1], [0], [0], [0, 0, 1, 0], [], []>} : vector<8x256xf32>, vector<8x256xf32>, vector<8x8xf32> -> vector<8x8xf32>
    %7 = arith.addf %5, %6 : vector<8x8xf32>
    %c0_5 = arith.constant 0 : index
    %c0_6 = arith.constant 0 : index
    %c0_7 = arith.constant 0 : index
    %8 = vector.load %arg3[%c0_5, %c0_6, %c0_7] : memref<1x8x8xf32, #tpu.memory_space<vmem>>, vector<1x8x8xf32>
    %9 = vector.shape_cast %8 : vector<1x8x8xf32> to vector<8x8xf32>
    %10 = vector.shape_cast %7 : vector<8x8xf32> to vector<1x8x8xf32>
    tpu.vector_store %arg3[%c0_5, %c0_6, %c0_7], %10 {strides = array<i32>} : memref<1x8x8xf32, #tpu.memory_space<vmem>>, vector<1x8x8xf32>,
    %c0_i32_8 = arith.constant 0 : i32
    %11 = arith.cmpi eq, %arg1, %c0_i32_8 : i32
    %12 = arith.extui %11 : i1 to i32
    %c0_i32_9 = arith.constant 0 : i32
    %13 = arith.cmpi ne, %12, %c0_i32_9 : i32
    scf.if %13 {
      %c0_10 = arith.constant 0 : index
      %c0_11 = arith.constant 0 : index
      %c0_12 = arith.constant 0 : index
      %14 = vector.load %arg3[%c0_10, %c0_11, %c0_12] : memref<1x8x8xf32, #tpu.memory_space<vmem>>, vector<1x8x8xf32>
      %15 = vector.shape_cast %14 : vector<1x8x8xf32> to vector<8x8xf32>
      %cst_13 = arith.constant 4.8828125E-4 : f32
      %16 = vector.broadcast %cst_13 : f32 to vector<8x8xf32>
      %17 = arith.mulf %15, %16 : vector<8x8xf32>
      %c0_14 = arith.constant 0 : index
      %c0_15 = arith.constant 0 : index
      %c0_16 = arith.constant 0 : index
      %18 = vector.load %arg3[%c0_14, %c0_15, %c0_16] : memref<1x8x8xf32, #tpu.memory_space<vmem>>, vector<1x8x8xf32>
      %19 = vector.shape_cast %18 : vector<1x8x8xf32> to vector<8x8xf32>
      %20 = vector.shape_cast %17 : vector<8x8xf32> to vector<1x8x8xf32>
      tpu.vector_store %arg3[%c0_14, %c0_15, %c0_16], %20 {strides = array<i32>} : memref<1x8x8xf32, #tpu.memory_space<vmem>>, vector<1x8x8xf32>,
    } else {
    }
    return
  }
  func.func @transform_0(%arg0: i32, %arg1: i32) -> (i32, i32) {
    %c1_i32 = arith.constant 1 : i32
    %0 = arith.muli %arg0, %c1_i32 : i32
    %1 = arith.addi %0, %arg1 : i32
    %c0_i32 = arith.constant 0 : i32
    %2 = arith.minsi %1, %c0_i32 : i32
    %c0_i32_0 = arith.constant 0 : i32
    %c0_i32_1 = arith.constant 0 : i32
    return %c0_i32_0, %2 : i32, i32
  }
  func.func @transform_1(%arg0: i32, %arg1: i32) -> (i32, i32, i32) {
    %c0_i32 = arith.constant 0 : i32
    %c0_i32_0 = arith.constant 0 : i32
    %c0_i32_1 = arith.constant 0 : i32
    return %arg0, %c0_i32, %c0_i32_0 : i32, i32, i32
  }
}

</mosaic_0001>

<bundles_post_ra>
// kernel: tpu_custom_call.1
= control target key start
LH: loop header
LB: loop body
LE: loop exit
PB: predicated region body
PF: predicated region fallthrough
CT: control target
= control target key end

     0   :  { %6 = vsyncpa [#allocation3], 0  ;;  %s205_s0 = inlined_call_operand.hbm [shape: f32[8,256], index: 0, kind: input, shape index: {}]   ;;  %s206_s1 = inlined_call_operand.hbm [shape: f32[1,8,8], index: 1, kind: output, shape index: {}]  }
   0x1   :  { %7 = vsyncpa [#allocation4], 0  ;;  %s183_s6 = smov [#allocation2]  }
   0x2   :  { %s20_s7 = sshll.u32 %s183_s6, 4  ;;  %s21_s7 = int_to_ptr.vmem [resolvable:$true] %s20_s7 }
   0x3   :  { %s147_s8 = scalar_lea.vmem %s21_s7, 256  ;;  %p152_p1 = scmp.lt.s32.totalorder %s21_s7, %s21_s7 }
   0x4   :  { %p148_p0 = scmp.ne.s32.totalorder %s21_s7, %s147_s8  ;;  %p153_p2 = scmp.lt.s32.totalorder %s147_s8, %s147_s8 }
   0x6   :  { %p154_p3 = por %p153_p2, %p152_p1 }
   0x8   :  { %p155_p4 = pnand %p154_p3, %p148_p0 }
   0xa   :  { %158 = shalt.err (!%p155_p4)
}
   0xb   :  { %23 = dma.hbm_to_vmem [thread:$0]  %s205_s0, 256, %s21_s7, [#allocation3]  }
   0xc   :  { %179 = dma.done.wait [#allocation3], 256  }
   0xd   :  { %180 = vsyncadd [#allocation3], 4294967040  ;;  %vm35_vm0 = vcmask 64512   ;;  %v184_v0 = vmov 0.0   ;;  %v38_v1 = vld [vmem:[#allocation2 + $0x8] sm:$0xff]  ;;  %v37_v2 = vld [vmem:[#allocation2] sm:$0xff] }
   0xe   :  { %36 = vst.msk [vmem:[#allocation5] sm:$0xff] %vm35_vm0, %v184_v0  ;;  %70 = vmatprep.subr.mxu0 %v38_v1  ;;  %104 = vmatprep.mubr.f32.mxu0 %v38_v1  ;;  %s185_s11 = smov [#allocation5]  }
   0xf   :  { %71 = vmatpush1.xpose.msra.mxu0 %v37_v2  ;;  %s125_s0 = sshll.u32 %s185_s11, 4  ;;  %s126_s0 = int_to_ptr.vmem [resolvable:$true] %s125_s0 }
  0x10   :  { %s159_s12 = scalar_lea.vmem %s126_s0, 128  ;;  %p164_p6 = scmp.lt.s32.totalorder %s126_s0, %s126_s0 }
  0x11   :  { %p160_p5 = scmp.ne.s32.totalorder %s126_s0, %s159_s12  ;;  %p165_p7 = scmp.lt.s32.totalorder %s159_s12, %s159_s12 }
  0x12   :  { %105 = vmatmul.mubr.f32.vlgmr.msra.gmra.mxu0 %v37_v2 }
  0x13   :  { %p166_p8 = por %p165_p7, %p164_p6 }
  0x15   :  { %v39_v3 = vld [vmem:[#allocation5] sm:$0xff]  ;;  %p167_p9 = pnand %p166_p8, %p160_p5 }
  0xd2   :  { %v106_v4 = vpop.f32.mrf.mxu0 }
  0xd3   :  { %v110_v5 = vadd.f32 %v106_v4, %v39_v3 }
  0xd4   :  { %v108_v6 = vpop.f32.mrf.mxu0 }
  0xd5   :  { %112 = vst.msk [vmem:[#allocation5] sm:$0xff] %vm35_vm0, %v110_v5 }
  0xdc   :  { %v116_v7 = vld [vmem:[#allocation5] sm:$0xff] }
  0xdd   :  { %v117_v8 = vmul.f32 0.00048828125, %v116_v7 }
  0xdf   :  { %118 = vst.msk [vmem:[#allocation5] sm:$0xff] %vm35_vm0, %v117_v8 }
  0xe0   :  { %170 = shalt.err (!%p167_p9)
}
  0xe1   :  { %128 = dma.vmem_to_hbm [thread:$0]  %s126_s0, 128, %s206_s1, [#allocation4]  }
  0xe2   :  { %181 = dma.done.wait [#allocation4], 128  }
  0xe3   :  { %182 = vsyncadd [#allocation4], 4294967168 }
  0xe4   :  { %132 = vsyncpa [#allocation3], 1 }
  0xe5   :  { %133 = vsyncpa [#allocation4], 1 }

</bundles_post_ra>
